<compile_context>
chip_gen: v7x
topology: tpu7x:2x2x1
jax: 0.10.0
libtpu: 0.0.40
codegen_flags: <defaults>
</compile_context>

<pallas_src>
import numpy as np
import jax
import jax.numpy as jnp
from jax.experimental import pallas as pl
from jax.experimental.pallas import tpu as pltpu

LANE = 128
SUBLANE = 8
WEIGHT_VMEM_BUDGET = 16 * 1024 * 1024   # budget for resident / in-flight weight tiles
TILE_BYTES_TARGET = 2 * 1024 * 1024     # per-buffer target size for x / out row tiles
VMEM_LIMIT_CAP = 48 * 1024 * 1024       # stay well under v7x's 64 MiB physical VMEM


def _round_up(x, m):
    return ((x + m - 1) // m) * m


def _cdiv(a, b):
    return -(-a // b)


# ----------------------------------------------------------------------------
# Kernels
# ----------------------------------------------------------------------------
def _ffn_kernel_fused(x_ref, w1_ref, b1_ref, w2_ref, b2_ref, o_ref):
    """Single hidden chunk: whole FFN in one shot, hidden stays in vregs/VMEM."""
    x = x_ref[...].astype(jnp.bfloat16)                       # cast at MXU boundary
    h = jnp.dot(x, w1_ref[...], preferred_element_type=jnp.float32)
    h = jnp.maximum(h + b1_ref[...], 0.0)                     # f32 epilogue (ReLU+bias)
    y = jnp.dot(h.astype(jnp.bfloat16), w2_ref[...],
                preferred_element_type=jnp.float32)
    o_ref[...] = (y + b2_ref[...]).astype(o_ref.dtype)


def _ffn_kernel_acc(x_ref, w1_ref, b1_ref, w2_ref, b2_ref, o_ref, acc_ref):
    """Hidden-dim tiled: accumulate partial second-matmul results in f32 scratch."""
    j = pl.program_id(1)

    @pl.when(j == 0)
    def _():
        acc_ref[...] = jnp.zeros_like(acc_ref)

    x = x_ref[...].astype(jnp.bfloat16)
    h = jnp.dot(x, w1_ref[...], preferred_element_type=jnp.float32)
    h = jnp.maximum(h + b1_ref[...], 0.0)
    acc_ref[...] += jnp.dot(h.astype(jnp.bfloat16), w2_ref[...],
                            preferred_element_type=jnp.float32)

    @pl.when(j == pl.num_programs(1) - 1)
    def _():
        o_ref[...] = (acc_ref[...] + b2_ref[...]).astype(o_ref.dtype)


# ----------------------------------------------------------------------------
# One-time parameter preparation (padding + bf16 cast hoisted out of forward)
# ----------------------------------------------------------------------------
def _plan_hidden(dim_p, hid_p, weight_budget):
    # Full W1 + W2 in bf16, single-buffered (constant index -> Buffered(1)).
    if 4 * dim_p * hid_p <= weight_budget:
        return hid_p, hid_p
    # Chunked + double-buffered: 2 bufs * (dim_p*tk + tk*dim_p) * 2 B = 8*dim_p*tk.
    tk = (weight_budget // (8 * dim_p)) // LANE * LANE
    tk = max(LANE, min(tk, 2048, hid_p))
    n_h = _cdiv(hid_p, tk)
    return tk, n_h * tk


def prepare_params(params, *, weight_vmem_budget=WEIGHT_VMEM_BUDGET):
    """Pad feature dims to lane multiples and cast weights to bf16 ONCE."""
    w1, b1, w2, b2 = params["w1"], params["b1"], params["w2"], params["b2"]
    dim, hidden = w1.shape
    dim_p = _round_up(dim, LANE)
    hid_p = _round_up(hidden, LANE)
    tk, hid_pad = _plan_hidden(dim_p, hid_p, weight_vmem_budget)
    return {
        "dim": dim, "hidden": hidden, "dim_p": dim_p, "hid_pad": hid_pad, "tk": tk,
        "w1": jnp.pad(w1, ((0, dim_p - dim), (0, hid_pad - hidden))).astype(jnp.bfloat16),
        "b1": jnp.pad(b1, (0, hid_pad - hidden)).reshape(1, hid_pad).astype(jnp.float32),
        "w2": jnp.pad(w2, ((0, hid_pad - hidden), (0, dim_p - dim))).astype(jnp.bfloat16),
        "b2": jnp.pad(b2, (0, dim_p - dim)).reshape(1, dim_p).astype(jnp.float32),
    }


# ----------------------------------------------------------------------------
# Forward
# ----------------------------------------------------------------------------
def feedforward2(x, p, out_dtype=None):
    """x: (..., dim).  p: output of prepare_params().  Returns (..., dim)."""
    dim, dim_p = p["dim"], p["dim_p"]
    hid_pad, tk = p["hid_pad"], p["tk"]
    n_h = hid_pad // tk
    out_dtype = out_dtype if out_dtype is not None else x.dtype

    lead = x.shape[:-1]
    rows = int(np.prod(lead)) if lead else 1
    x2 = x.reshape(rows, dim)

    # ---- row tiling ---------------------------------------------------------
    rows8 = _round_up(rows, SUBLANE)
    tm_cap = max(SUBLANE,
                 min(2048, (TILE_BYTES_TARGET // (4 * dim_p)) // SUBLANE * SUBLANE))
    n_r = _cdiv(rows8, tm_cap)
    if rows8 >= 512:
        n_r = max(n_r, 2)                      # keep both v7x TensorCores busy
    tm = _round_up(_cdiv(rows8, n_r), SUBLANE)
    rows_pad = n_r * tm                        # tight padding (no round-up to 512)

    # Pad x only when needed; fuse the bf16 cast into the same pass. Otherwise
    # pass x untouched and cast inside the kernel (single HBM read of x).
    if rows_pad != rows or dim_p != dim:
        x2 = jnp.pad(x2, ((0, rows_pad - rows), (0, dim_p - dim))).astype(jnp.bfloat16)

    # ---- VMEM budget / compiler params --------------------------------------
    x_bytes = jnp.dtype(x2.dtype).itemsize
    o_bytes = jnp.dtype(out_dtype).itemsize
    w_bufs = 1 if n_h == 1 else 2
    est = (w_bufs * 4 * dim_p * tk                      # W1 + W2 tiles (bf16)
           + w_bufs * 4 * (tk + dim_p)                  # biases (f32)
           + 2 * tm * dim_p * x_bytes                   # x tile, double-buffered
           + 2 * tm * dim_p * o_bytes                   # out tile, double-buffered
           + (tm * dim_p * 4 if n_h > 1 else 0))        # f32 accumulator scratch
    vmem_limit = min(max(int(est * 1.3) + (2 << 20), 16 << 20), VMEM_LIMIT_CAP)

    resident = pl.Buffered(1)   # constant index_map -> never refetched, 1 buffer

    if n_h == 1:
        grid_spec = pltpu.PrefetchScalarGridSpec(
            num_scalar_prefetch=0,
            grid=(n_r,),
            in_specs=[
                pl.BlockSpec((tm, dim_p), lambda i: (i, 0)),                      # x
                pl.BlockSpec((dim_p, hid_pad), lambda i: (0, 0), pipeline_mode=resident),
                pl.BlockSpec((1, hid_pad), lambda i: (0, 0), pipeline_mode=resident),
                pl.BlockSpec((hid_pad, dim_p), lambda i: (0, 0), pipeline_mode=resident),
                pl.BlockSpec((1, dim_p), lambda i: (0, 0), pipeline_mode=resident),
            ],
            out_specs=pl.BlockSpec((tm, dim_p), lambda i: (i, 0)),
        )
        kernel = _ffn_kernel_fused
        dims = ("parallel",)
    else:
        grid_spec = pltpu.PrefetchScalarGridSpec(
            num_scalar_prefetch=0,
            grid=(n_r, n_h),
            in_specs=[
                pl.BlockSpec((tm, dim_p), lambda i, j: (i, 0)),                   # x
                pl.BlockSpec((dim_p, tk), lambda i, j: (0, j)),                   # W1 cols
                pl.BlockSpec((1, tk), lambda i, j: (0, j)),                       # b1 chunk
                pl.BlockSpec((tk, dim_p), lambda i, j: (j, 0)),                   # W2 rows
                pl.BlockSpec((1, dim_p), lambda i, j: (0, 0), pipeline_mode=resident),
            ],
            out_specs=pl.BlockSpec((tm, dim_p), lambda i, j: (i, 0)),
            scratch_shapes=[pltpu.VMEM((tm, dim_p), jnp.float32)],
        )
        kernel = _ffn_kernel_acc
        dims = ("parallel", "arbitrary")

    out = pl.pallas_call(
        kernel,
        out_shape=jax.ShapeDtypeStruct((rows_pad, dim_p), out_dtype),
        grid_spec=grid_spec,
        compiler_params=pltpu.CompilerParams(
            dimension_semantics=dims,
            vmem_limit_bytes=vmem_limit,
        ),
    )(x2, p["w1"], p["b1"], p["w2"], p["b2"])

    if rows_pad != rows or dim_p != dim:
        out = out[:rows, :dim]
    return out.reshape(*lead, dim)


# ----------------------------------------------------------------------------
# Parameter init matching torch nn.Linear default: U(-1/sqrt(fan_in), 1/sqrt(fan_in))
# ----------------------------------------------------------------------------
def init_params(key, dim, hidden_dim):
    k1, k2, k3, k4 = jax.random.split(key, 4)
    b1 = 1.0 / np.sqrt(dim)
    b2 = 1.0 / np.sqrt(hidden_dim)
    return {
        "w1": jax.random.uniform(k1, (dim, hidden_dim), jnp.float32, -b1, b1),
        "b1": jax.random.uniform(k2, (hidden_dim,), jnp.float32, -b1, b1),
        "w2": jax.random.uniform(k3, (hidden_dim, dim), jnp.float32, -b2, b2),
        "b2": jax.random.uniform(k4, (dim,), jnp.float32, -b2, b2),
    }


def _reference(x, raw):
    h = jnp.maximum(x @ raw["w1"] + raw["b1"], 0.0)
    return h @ raw["w2"] + raw["b2"]


# ----------------------------------------------------------------------------
if __name__ == "__main__":
    # Small shapes consistent with the module: token batch (B, S, dim).
    batch, seq = 2, 16
    dim, hidden_dim = 64, 128

    key = jax.random.PRNGKey(0)
    kp, kx = jax.random.split(key)
    raw = init_params(kp, dim, hidden_dim)
    params = prepare_params(raw)                       # one-time pad + bf16 cast
    x = jax.random.normal(kx, (batch, seq, dim), jnp.float32)

    out = jax.block_until_ready(feedforward2(x, params))
    assert out.shape == (batch, seq, dim), out.shape
    err = float(jnp.max(jnp.abs(out - _reference(x, raw))))
    assert err < 0.1, f"max abs err {err}"             # bf16-MXU tolerance

    # Also exercise the hidden-dim-tiled (accumulating) path by forcing a tiny
    # weight-VMEM budget (tk=128 over hidden=384 -> 3 chunks).
    dim2, hidden2 = 64, 384
    raw2 = init_params(jax.random.PRNGKey(1), dim2, hidden2)
    params2 = prepare_params(raw2, weight_vmem_budget=64 * 1024)
    x2 = jax.random.normal(jax.random.PRNGKey(2), (4, 8, dim2), jnp.float32)
    out2 = jax.block_until_ready(feedforward2(x2, params2))
    err2 = float(jnp.max(jnp.abs(out2 - _reference(x2, raw2))))
    assert err2 < 0.1, f"max abs err (tiled) {err2}"

    print("KERNEL_OK")
</pallas_src>

<mosaic_0001>
module attributes {stable_mosaic.version = 11 : i64} {
  func.func @_ffn_kernel_fused(%arg0: i32, %arg1: memref<32x128xbf16, #tpu.memory_space<vmem>>, %arg2: memref<128x128xbf16, #tpu.memory_space<vmem>>, %arg3: memref<1x128xf32, #tpu.memory_space<vmem>>, %arg4: memref<128x128xbf16, #tpu.memory_space<vmem>>, %arg5: memref<1x128xf32, #tpu.memory_space<vmem>>, %arg6: memref<32x128xf32, #tpu.memory_space<vmem>>) attributes {dimension_semantics = [#tpu.dimension_semantics<parallel>], iteration_bounds = array<i64: 1>, scalar_prefetch = 0 : i64, scratch_operands = 0 : i64, tpu.core_type = #tpu.core_type<tc>, window_params = [{transform_indices = @transform_0, window_bounds = array<i64: 32, 128>}, {pipeline_mode = #tpu.pipeline_mode<synchronous>, transform_indices = @transform_1, window_bounds = array<i64: 128, 128>}, {pipeline_mode = #tpu.pipeline_mode<synchronous>, transform_indices = @transform_2, window_bounds = array<i64: 1, 128>}, {pipeline_mode = #tpu.pipeline_mode<synchronous>, transform_indices = @transform_3, window_bounds = array<i64: 128, 128>}, {pipeline_mode = #tpu.pipeline_mode<synchronous>, transform_indices = @transform_4, window_bounds = array<i64: 1, 128>}, {transform_indices = @transform_5, window_bounds = array<i64: 32, 128>}]} {
    %c0 = arith.constant 0 : index
    %c0_0 = arith.constant 0 : index
    %0 = vector.load %arg1[%c0, %c0_0] : memref<32x128xbf16, #tpu.memory_space<vmem>>, vector<32x128xbf16>
    %c0_1 = arith.constant 0 : index
    %c0_2 = arith.constant 0 : index
    %1 = vector.load %arg2[%c0_1, %c0_2] : memref<128x128xbf16, #tpu.memory_space<vmem>>, vector<128x128xbf16>
    %cst = arith.constant dense<0.000000e+00> : vector<32x128xf32>
    %2 = tpu.matmul %0, %1, %cst {dimension_numbers = #tpu.dot_dimension_numbers<[1], [0], [0], [1], [0, 0, 1, 1], [], []>} : vector<32x128xbf16>, vector<128x128xbf16>, vector<32x128xf32> -> vector<32x128xf32>
    %c0_3 = arith.constant 0 : index
    %c0_4 = arith.constant 0 : index
    %3 = vector.load %arg3[%c0_3, %c0_4] : memref<1x128xf32, #tpu.memory_space<vmem>>, vector<1x128xf32>
    %4 = vector.broadcast %3 : vector<1x128xf32> to vector<32x128xf32>
    %5 = arith.addf %2, %4 : vector<32x128xf32>
    %cst_5 = arith.constant 0.000000e+00 : f32
    %6 = vector.broadcast %cst_5 : f32 to vector<32x128xf32>
    %7 = arith.maximumf %5, %6 : vector<32x128xf32>
    %8 = arith.truncf %7 : vector<32x128xf32> to vector<32x128xbf16>
    %c0_6 = arith.constant 0 : index
    %c0_7 = arith.constant 0 : index
    %9 = vector.load %arg4[%c0_6, %c0_7] : memref<128x128xbf16, #tpu.memory_space<vmem>>, vector<128x128xbf16>
    %cst_8 = arith.constant dense<0.000000e+00> : vector<32x128xf32>
    %10 = tpu.matmul %8, %9, %cst_8 {dimension_numbers = #tpu.dot_dimension_numbers<[1], [0], [0], [1], [0, 0, 1, 1], [], []>} : vector<32x128xbf16>, vector<128x128xbf16>, vector<32x128xf32> -> vector<32x128xf32>
    %c0_9 = arith.constant 0 : index
    %c0_10 = arith.constant 0 : index
    %11 = vector.load %arg5[%c0_9, %c0_10] : memref<1x128xf32, #tpu.memory_space<vmem>>, vector<1x128xf32>
    %12 = vector.broadcast %11 : vector<1x128xf32> to vector<32x128xf32>
    %13 = arith.addf %10, %12 : vector<32x128xf32>
    %c0_11 = arith.constant 0 : index
    %c0_12 = arith.constant 0 : index
    %14 = vector.load %arg6[%c0_11, %c0_12] : memref<32x128xf32, #tpu.memory_space<vmem>>, vector<32x128xf32>
    tpu.vector_store %arg6[%c0_11, %c0_12], %13 {strides = array<i32>} : memref<32x128xf32, #tpu.memory_space<vmem>>, vector<32x128xf32>,
    return
  }
  func.func @transform_0(%arg0: i32) -> (i32, i32) {
    %c0_i32 = arith.constant 0 : i32
    %c0_i32_0 = arith.constant 0 : i32
    return %arg0, %c0_i32 : i32, i32
  }
  func.func @transform_1(%arg0: i32) -> (i32, i32) {
    %c0_i32 = arith.constant 0 : i32
    %c0_i32_0 = arith.constant 0 : i32
    %c0_i32_1 = arith.constant 0 : i32
    return %c0_i32, %c0_i32_0 : i32, i32
  }
  func.func @transform_2(%arg0: i32) -> (i32, i32) {
    %c0_i32 = arith.constant 0 : i32
    %c0_i32_0 = arith.constant 0 : i32
    %c0_i32_1 = arith.constant 0 : i32
    return %c0_i32, %c0_i32_0 : i32, i32
  }
  func.func @transform_3(%arg0: i32) -> (i32, i32) {
    %c0_i32 = arith.constant 0 : i32
    %c0_i32_0 = arith.constant 0 : i32
    %c0_i32_1 = arith.constant 0 : i32
    return %c0_i32, %c0_i32_0 : i32, i32
  }
  func.func @transform_4(%arg0: i32) -> (i32, i32) {
    %c0_i32 = arith.constant 0 : i32
    %c0_i32_0 = arith.constant 0 : i32
    %c0_i32_1 = arith.constant 0 : i32
    return %c0_i32, %c0_i32_0 : i32, i32
  }
  func.func @transform_5(%arg0: i32) -> (i32, i32) {
    %c0_i32 = arith.constant 0 : i32
    %c0_i32_0 = arith.constant 0 : i32
    return %arg0, %c0_i32 : i32, i32
  }
}

</mosaic_0001>

<bundles_post_ra>
// kernel: tpu_custom_call.1
= control target key start
LH: loop header
LB: loop body
LE: loop exit
PB: predicated region body
PF: predicated region fallthrough
CT: control target
= control target key end

     0   :  { %10 = vsyncpa [#allocation3], 0  ;;  %s655_s0 = inlined_call_operand.hbm [shape: bf16[32,128], index: 0, kind: input, shape index: {}]   ;;  %s656_s1 = inlined_call_operand.hbm [shape: bf16[128,128], index: 1, kind: input, shape index: {}]   ;;  %s657_s2 = inlined_call_operand.vmem [shape: f32[1,128], index: 2, kind: input, shape index: {}]   ;;  %s658_s3 = inlined_call_operand.hbm [shape: bf16[128,128], index: 3, kind: input, shape index: {}]   ;;  %s659_s4 = inlined_call_operand.vmem [shape: f32[1,128], index: 4, kind: input, shape index: {}]   ;;  %s660_s5 = inlined_call_operand.hbm [shape: f32[32,128], index: 5, kind: output, shape index: {}]  }
   0x1   :  { %11 = vsyncpa [#allocation6], 0 }
   0x2   :  { %12 = vsyncpa [#allocation4], 0  ;;  %s547_s18 = smov [#allocation5]   ;;  %s548_s20 = smov [#allocation2]  }
   0x3   :  { %s30_s19 = sshll.u32 %s547_s18, 4  ;;  %s18_s21 = sshll.u32 %s548_s20, 4  ;;  %s31_s19 = int_to_ptr.vmem [resolvable:$true] %s30_s19  ;;  %s585_s21 = int_to_ptr.vmem [resolvable:$true] %s18_s21 }
   0x4   :  { %s453_s24 = scalar_lea.hbm %s656_s1, 1024 }
   0x5   :  { %p454_p0 = scmp.ne.s32.totalorder %s656_s1, %s453_s24  ;;  %p457_p1 = scmp.lt.u32.totalorder %s453_s24, %s656_s1 }
   0x7   :  { %p459_p2 = pnand %p457_p1, %p454_p0 }
   0x9   :  { %462 = shalt.err (!%p459_p2)
}
   0xa   :  { %s463_s29 = scalar_lea.vmem %s31_s19, 1024  ;;  %p468_p4 = scmp.lt.s32.totalorder %s31_s19, %s31_s19 }
   0xb   :  { %p464_p3 = scmp.ne.s32.totalorder %s31_s19, %s463_s29  ;;  %p469_p5 = scmp.lt.s32.totalorder %s463_s29, %s463_s29 }
   0xd   :  { %p470_p6 = por %p469_p5, %p468_p4 }
   0xf   :  { %p471_p7 = pnand %p470_p6, %p464_p3 }
  0x11   :  { %474 = shalt.err (!%p471_p7)
}
  0x12   :  { %s549_s30 = smov 64   ;;  %s550_s6 = smov 4  }
  0x13   :  { %36 = dma.hbm_to_vmem [thread:$0]  %s656_s1, 1024, %s31_s19, [#allocation6], %s549_s30, %s549_s30, %s550_s6  }
  0x14   :  { %s475_s11 = scalar_lea.hbm %s655_s0, 256 }
  0x15   :  { %p476_p8 = scmp.ne.s32.totalorder %s655_s0, %s475_s11  ;;  %p479_p9 = scmp.lt.u32.totalorder %s475_s11, %s655_s0 }
  0x17   :  { %p481_p10 = pnand %p479_p9, %p476_p8 }
  0x19   :  { %484 = shalt.err (!%p481_p10)
}
  0x1a   :  { %s485_s16 = scalar_lea.vmem %s585_s21, 256  ;;  %p490_p12 = scmp.lt.s32.totalorder %s585_s21, %s585_s21 }
  0x1b   :  { %p486_p11 = scmp.ne.s32.totalorder %s585_s21, %s485_s16  ;;  %p491_p13 = scmp.lt.s32.totalorder %s485_s16, %s485_s16 }
  0x1d   :  { %p492_p0 = por %p491_p13, %p490_p12 }
  0x1f   :  { %p493_p1 = pnand %p492_p0, %p486_p11 }
  0x21   :  { %496 = shalt.err (!%p493_p1)
}
  0x22   :  { %24 = dma.hbm_to_vmem [thread:$0]  %s655_s0, 256, %s585_s21, [#allocation3], %s549_s30, %s549_s30, %s550_s6  }
  0x23   :  { %s551_s18 = smov [#allocation7]   ;;  %s497_s23 = scalar_lea.hbm %s658_s3, 1024 }
  0x24   :  { %s44_s19 = sshll.u32 %s551_s18, 4  ;;  %p498_p2 = scmp.ne.s32.totalorder %s658_s3, %s497_s23  ;;  %s45_s19 = int_to_ptr.vmem [resolvable:$true] %s44_s19 }
  0x25   :  { %p501_p3 = scmp.lt.u32.totalorder %s497_s23, %s658_s3 }
  0x27   :  { %p503_p4 = pnand %p501_p3, %p498_p2 }
  0x29   :  { %506 = shalt.err (!%p503_p4)
}
  0x2a   :  { %s507_s28 = scalar_lea.vmem %s45_s19, 1024  ;;  %p512_p6 = scmp.lt.s32.totalorder %s45_s19, %s45_s19 }
  0x2b   :  { %p508_p5 = scmp.ne.s32.totalorder %s45_s19, %s507_s28  ;;  %p513_p7 = scmp.lt.s32.totalorder %s507_s28, %s507_s28 }
  0x2d   :  { %p514_p8 = por %p513_p7, %p512_p6 }
  0x2f   :  { %p515_p9 = pnand %p514_p8, %p508_p5 }
  0x31   :  { %518 = shalt.err (!%p515_p9)
}
  0x32   :  { %50 = dma.hbm_to_vmem [thread:$0]  %s658_s3, 1024, %s45_s19, [#allocation6], %s549_s30, %s549_s30, %s550_s6  }
  0x33   :  { %541 = dma.done.wait [#allocation3], 256  }
  0x34   :  { %542 = vsyncadd [#allocation3], 4294967040 }
  0x35   :  { %543 = dma.done.wait [#allocation6], 2048  }
  0x36   :  { %544 = vsyncadd [#allocation6], 4294965248  ;;  %v435_v0 = vld [vmem:[#allocation5] sm:$0xff]   ;;  %v436_v1 = vld [vmem:[#allocation5 + $0x8] sm:$0xff]  }
  0x37   :  { %387 = vmatprep.subr.bf16.mxu0 %v435_v0  ;;  %v437_v2 = vld [vmem:[#allocation5 + $0x10] sm:$0xff]   ;;  %v438_v3 = vld [vmem:[#allocation5 + $0x18] sm:$0xff]   ;;  %v445_v5 = vld [vmem:[#allocation7] sm:$0xff]  }
  0x38   :  { %388 = vmatpush3.bf16.msra.mxu0 %v435_v0  ;;  %v443_v4 = vld [vmem:[#allocation2] sm:$0xff]   ;;  %v446_v6 = vld [vmem:[#allocation7 + $0x8] sm:$0xff]   ;;  %v439_v7 = vld [vmem:[#allocation5 + $0x20] sm:$0xff]   ;;  %407 = vmatprep.subr.bf16.mxu1 %v445_v5 }
  0x39   :  { %389 = vmatprep.subr.bf16.mxu0 %v436_v1  ;;  %403 = vmatprep.mubr.bf16.mxu0 %v443_v4  ;;  %v447_v8 = vld [vmem:[#allocation7 + $0x10] sm:$0xff]   ;;  %v440_v9 = vld [vmem:[#allocation5 + $0x28] sm:$0xff]   ;;  %v448_v10 = vld [vmem:[#allocation7 + $0x18] sm:$0xff]  }
  0x3a   :  { %408 = vmatpush3.bf16.msra.mxu1 %v445_v5  ;;  %v441_v11 = vld [vmem:[#allocation5 + $0x30] sm:$0xff]   ;;  %v449_v12 = vld [vmem:[#allocation7 + $0x20] sm:$0xff]   ;;  %v442_v13 = vld [vmem:[#allocation5 + $0x38] sm:$0xff]  }
  0x3b   :  { %409 = vmatprep.subr.bf16.mxu1 %v446_v6  ;;  %v450_v14 = vld [vmem:[#allocation7 + $0x28] sm:$0xff]   ;;  %v444_v15 = vld [vmem:[#allocation2 + $0x8] sm:$0xff]   ;;  %v451_v16 = vld [vmem:[#allocation7 + $0x30] sm:$0xff]  }
  0x3c   :  { %390 = vmatpush3.bf16.msra.mxu0 %v436_v1  ;;  %v452_v17 = vld [vmem:[#allocation7 + $0x38] sm:$0xff]   ;;  %v347_v18 = vld [vmem:[%s657_s2] ss:$0 sm:$0xff]  ;;  %s552_s2 = smov [#allocation8]  }
  0x3d   :  { %391 = vmatprep.subr.bf16.mxu0 %v437_v2  ;;  %v358_v33 = vld [vmem:[%s659_s4] ss:$0 sm:$0xff]  ;;  %s334_s7 = sshll.u32 %s552_s2, 4  ;;  %s335_s7 = int_to_ptr.vmem [resolvable:$true] %s334_s7 }
  0x3e   :  { %410 = vmatpush3.bf16.msra.mxu1 %v446_v6  ;;  %s519_s8 = scalar_lea.vmem %s335_s7, 512  ;;  %p524_p11 = scmp.lt.s32.totalorder %s335_s7, %s335_s7 }
  0x3f   :  { %411 = vmatprep.subr.bf16.mxu1 %v447_v8  ;;  %p520_p10 = scmp.ne.s32.totalorder %s335_s7, %s519_s8  ;;  %p525_p12 = scmp.lt.s32.totalorder %s519_s8, %s519_s8 }
  0x40   :  { %392 = vmatpush3.bf16.msra.mxu0 %v437_v2 }
  0x41   :  { %393 = vmatprep.subr.bf16.mxu0 %v438_v3  ;;  %p526_p13 = por %p525_p12, %p524_p11 }
  0x42   :  { %412 = vmatpush3.bf16.msra.mxu1 %v447_v8 }
  0x43   :  { %413 = vmatprep.subr.bf16.mxu1 %v448_v10  ;;  %p527_p0 = pnand %p526_p13, %p520_p10 }
  0x44   :  { %394 = vmatpush3.bf16.msra.mxu0 %v438_v3 }
  0x45   :  { %395 = vmatprep.subr.bf16.mxu0 %v439_v7 }
  0x46   :  { %414 = vmatpush3.bf16.msra.mxu1 %v448_v10 }
  0x47   :  { %415 = vmatprep.subr.bf16.mxu1 %v449_v12 }
  0x48   :  { %396 = vmatpush3.bf16.msra.mxu0 %v439_v7 }
  0x49   :  { %397 = vmatprep.subr.bf16.mxu0 %v440_v9 }
  0x4a   :  { %416 = vmatpush3.bf16.msra.mxu1 %v449_v12 }
  0x4b   :  { %417 = vmatprep.subr.bf16.mxu1 %v450_v14 }
  0x4c   :  { %398 = vmatpush3.bf16.msra.mxu0 %v440_v9 }
  0x4d   :  { %399 = vmatprep.subr.bf16.mxu0 %v441_v11 }
  0x4e   :  { %418 = vmatpush3.bf16.msra.mxu1 %v450_v14 }
  0x4f   :  { %419 = vmatprep.subr.bf16.mxu1 %v451_v16 }
  0x50   :  { %400 = vmatpush3.bf16.msra.mxu0 %v441_v11 }
  0x51   :  { %401 = vmatprep.subr.bf16.mxu0 %v442_v13 }
  0x52   :  { %420 = vmatpush3.bf16.msra.mxu1 %v451_v16 }
  0x53   :  { %421 = vmatprep.subr.bf16.mxu1 %v452_v17 }
  0x54   :  { %402 = vmatpush3.bf16.msra.mxu0 %v442_v13 }
  0x56   :  { %422 = vmatpush3.bf16.msra.mxu1 %v452_v17 }
  0x57   :  { %404 = vmatmul.mubr.bf16.vlgmr.msra.gmra.mrb[0].mxu0 %v444_v15 }
 0x12a   :  { %v405_v19 = vpop.f32.mrb[0].mxu0 }
 0x12b   :  { %v193_v20 = vadd.f32 %v405_v19, %v347_v18  ;;  %v184_v21 = vpop.f32.mrb[1].mxu0 }
 0x12c   :  { %v185_v22 = vadd.f32 %v347_v18, %v184_v21  ;;  %v406_v23 = vpop.f32.mrb[2].mxu0 }
 0x12d   :  { %v196_v24 = vadd.f32 %v406_v23, %v347_v18  ;;  %v187_v25 = vpop.f32.mrb[3].mxu0  ;;  %v201_v27 = vmax.f32 %v193_v20, 0.0 }
 0x12e   :  { %v188_v26 = vadd.f32 %v347_v18, %v187_v25  ;;  %v199_v29 = vmax.f32 %v185_v22, 0.0 }
 0x12f   :  { %v202_v28 = vmax.f32 %v196_v24, 0.0 }
 0x130   :  { %v200_v30 = vmax.f32 %v188_v26, 0.0 }
 0x131   :  { %v204_v31 = vpack.c.bf16 %v202_v28, %v201_v27 }
 0x132   :  { %v203_v32 = vpack.c.bf16 %v200_v30, %v199_v29 }
 0x134   :  { %423 = vmatprep.mubr.bf16.mxu1 %v203_v32 }
 0x135   :  { %424 = vmatmul.mubr.bf16.vlgmr.msra.gmra.mrb[0].mxu1 %v204_v31 }
 0x208   :  { %v425_v34 = vpop.f32.mrb[0].mxu1 }
 0x209   :  { %v319_v35 = vadd.f32 %v425_v34, %v358_v33  ;;  %v310_v36 = vpop.f32.mrb[1].mxu1 }
 0x20a   :  { %v311_v37 = vadd.f32 %v358_v33, %v310_v36  ;;  %v426_v38 = vpop.f32.mrb[2].mxu1 }
 0x20b   :  { %327 = vst [vmem:[#allocation8 + $0x10] sm:$0xff] %v319_v35  ;;  %v322_v39 = vadd.f32 %v426_v38, %v358_v33  ;;  %v313_v40 = vpop.f32.mrb[3].mxu1 }
 0x20c   :  { %325 = vst [vmem:[#allocation8] sm:$0xff] %v311_v37  ;;  %v314_v41 = vadd.f32 %v358_v33, %v313_v40 }
 0x20d   :  { %328 = vst [vmem:[#allocation8 + $0x18] sm:$0xff] %v322_v39 }
 0x20e   :  { %326 = vst [vmem:[#allocation8 + $0x8] sm:$0xff] %v314_v41 }
 0x20f   :  { %530 = shalt.err (!%p527_p0)
}
 0x210   :  { %s531_s10 = scalar_lea.hbm %s660_s5, 512 }
 0x211   :  { %p532_p1 = scmp.ne.s32.totalorder %s660_s5, %s531_s10  ;;  %p535_p2 = scmp.lt.u32.totalorder %s531_s10, %s660_s5 }
 0x213   :  { %p537_p3 = pnand %p535_p2, %p532_p1 }
 0x215   :  { %540 = shalt.err (!%p537_p3)
}
 0x216   :  { %s553_s15 = smov 128   ;;  %s554_s16 = smov 8  }
 0x217   :  { %340 = dma.vmem_to_hbm [thread:$0]  %s335_s7, 512, %s660_s5, [#allocation4], %s553_s15, %s553_s15, %s554_s16  }
 0x218   :  { %545 = dma.done.wait [#allocation4], 512  }
 0x219   :  { %546 = vsyncadd [#allocation4], 4294966784 }
 0x21a   :  { %344 = vsyncpa [#allocation3], 1 }
 0x21b   :  { %345 = vsyncpa [#allocation6], 1 }
 0x21c   :  { %346 = vsyncpa [#allocation4], 1 }

</bundles_post_ra>
